<compile_context>
chip_gen: v7x
topology: tpu7x:2x2x1
jax: 0.10.0
libtpu: 0.0.40
codegen_flags: <defaults>
</compile_context>

<pallas_src>
import jax
import jax.numpy as jnp
from jax.experimental import pallas as pl
from jax.experimental.pallas import tpu as pltpu


# ---------------------------------------------------------------------------
# Pallas kernels: lane-dense 1x1 convs, computed as W(Cout,Cin) @ X(Cin, TN)
# ---------------------------------------------------------------------------
def _conv1x1_lrelu_kernel(x_ref, w_ref, b_ref, o_ref):
    # o = leaky_relu_0.2(W @ x + b);  x: (1,Cin,TN), w: (Cout,Cin), b: (Cout,1)
    y = jnp.dot(w_ref[...], x_ref[0], preferred_element_type=jnp.float32)
    y = y + b_ref[...]
    o_ref[0] = jnp.where(y >= 0, y, 0.2 * y).astype(o_ref.dtype)


def _conv1x1_residual_kernel(x_ref, r_ref, w_ref, b_ref, o_ref):
    # o = W @ (x + r) + b   (conv2: fused residual add, no activation)
    s = x_ref[0] + r_ref[0]
    y = jnp.dot(w_ref[...], s, preferred_element_type=jnp.float32)
    o_ref[0] = (y + b_ref[...]).astype(o_ref.dtype)


def _pick_tile(n, tn_max):
    # Full extent if it fits (block dim == array dim is always legal), else a
    # 128-multiple tile; the trailing partial tile is handled by write-masking.
    return n if n <= tn_max else tn_max


def _conv1x1_call(kernel, inputs, w, b, tn_max):
    B, Cin, N = inputs[0].shape
    Cout = w.shape[0]
    tn = _pick_tile(N, tn_max)
    grid = (B, pl.cdiv(N, tn))

    act_spec = pl.BlockSpec((1, Cin, tn), lambda bi, j: (bi, 0, j))
    in_specs = [act_spec] * len(inputs) + [
        pl.BlockSpec((Cout, Cin), lambda bi, j: (0, 0)),
        pl.BlockSpec((Cout, 1), lambda bi, j: (0, 0)),
    ]
    cost = pl.CostEstimate(
        flops=2 * B * N * Cin * Cout,
        transcendentals=0,
        bytes_accessed=4 * (len(inputs) * B * N * Cin + B * N * Cout
                            + Cin * Cout + Cout),
    )
    return pl.pallas_call(
        kernel,
        out_shape=jax.ShapeDtypeStruct((B, Cout, N), inputs[0].dtype),
        grid_spec=pltpu.PrefetchScalarGridSpec(
            num_scalar_prefetch=0,
            grid=grid,
            in_specs=in_specs,
            out_specs=pl.BlockSpec((1, Cout, tn), lambda bi, j: (bi, 0, j)),
        ),
        compiler_params=pltpu.CompilerParams(
            dimension_semantics=("parallel", "parallel")),
        cost_estimate=cost,
    )(*inputs, w, b.reshape(Cout, 1))


def conv1x1_lrelu(x, w, b, tn_max=1024):
    """leaky_relu_0.2(w @ x + b) per batch.  x: (B,Cin,N), w: (Cout,Cin)."""
    return _conv1x1_call(_conv1x1_lrelu_kernel, (x,), w, b, tn_max)


def conv1x1_residual(x, r, w, b, tn_max=1024):
    """w @ (x + r) + b per batch.  x, r: (B,Cin,N), w: (Cout,Cin)."""
    return _conv1x1_call(_conv1x1_residual_kernel, (x, r), w, b, tn_max)


# ---------------------------------------------------------------------------
# SpectralTransform forward (last_conv=False, the module default)
# ---------------------------------------------------------------------------
def spectral_transform(x, params):
    """x: (B, E, H, W) float32 NCHW.  Returns (B, E, H, W).

    Weights use the PyTorch Conv2d convention (Cout, Cin) with the 1x1 kernel
    squeezed; wfu/bfu follow FourierUnit's interleaved [re0, im0, re1, ...]
    channel convention and are permuted here once at trace time.
    """
    w1, b1, wfu, bfu, w2, b2 = params
    B, E, H, W = x.shape
    C = E // 2
    HW = H * W

    # conv1: 1x1 (E -> C) + LeakyReLU(0.2) on the contiguous (B, E, H*W) view.
    x1 = conv1x1_lrelu(x.reshape(B, E, HW), w1, b1)               # (B, C, HW)

    # --- FourierUnit ---
    # TODO(synk): FFT has no Pallas primitive; rfft2/irfft2 stay in plain JAX.
    ff = jnp.fft.rfft2(x1.reshape(B, C, H, W), norm="ortho")      # (B, C, H, Wr)
    Wr = ff.shape[-1]
    # Keep spectrum as [real block | imag block] on channels; fold the
    # interleave into a one-time (2C, 2C) weight / bias permutation instead.
    f = jnp.concatenate([jnp.real(ff), jnp.imag(ff)], axis=1)     # (B, 2C, H, Wr)
    perm = jnp.concatenate([2 * jnp.arange(C), 2 * jnp.arange(C) + 1])
    wfu_c = wfu[perm][:, perm]
    bfu_c = bfu[perm]
    y = conv1x1_lrelu(f.reshape(B, 2 * C, H * Wr), wfu_c, bfu_c)  # (B, 2C, H*Wr)
    y = y.reshape(B, 2 * C, H, Wr)
    yc = jax.lax.complex(y[:, :C], y[:, C:])
    fu_out = jnp.fft.irfft2(yc, s=(H, W), norm="ortho")           # (B, C, H, W)

    # conv2 on (x1 + fu_out): 1x1 (C -> E), residual add fused in the kernel.
    out = conv1x1_residual(x1, fu_out.reshape(B, C, HW), w2, b2)  # (B, E, HW)
    return out.reshape(B, E, H, W)


# ---------------------------------------------------------------------------
# Pure-JAX reference (mirrors the PyTorch module exactly)
# ---------------------------------------------------------------------------
def spectral_transform_ref(x, params):
    w1, b1, wfu, bfu, w2, b2 = params
    B, E, H, W = x.shape
    C = E // 2

    def conv1x1(z, w, b):  # z: NCHW, w: (Cout, Cin)
        return jnp.einsum("oc,bchw->bohw", w, z) + b[None, :, None, None]

    lrelu = lambda z: jnp.where(z >= 0, z, 0.2 * z)

    x1 = lrelu(conv1x1(x, w1, b1))
    ff = jnp.fft.rfft2(x1, norm="ortho")
    Wr = ff.shape[-1]
    f = jnp.stack([jnp.real(ff), jnp.imag(ff)], axis=2).reshape(B, 2 * C, H, Wr)
    y = lrelu(conv1x1(f, wfu, bfu)).reshape(B, C, 2, H, Wr)
    yc = y[:, :, 0] + 1j * y[:, :, 1]
    fu_out = jnp.fft.irfft2(yc, s=(H, W), norm="ortho")
    return conv1x1(x1 + fu_out, w2, b2)


# ---------------------------------------------------------------------------
if __name__ == "__main__":
    B, E, H, W = 2, 4, 16, 16  # embed_dim=4 -> hidden channels E//2 = 2

    key = jax.random.PRNGKey(0)
    k1, k2, k3, k4, k5, k6, kx = jax.random.split(key, 7)

    # Deterministic synthetic parameters, PyTorch Conv2d layout (Cout, Cin):
    # conv1: Conv2d(E, E//2, 1)      -> (E//2, E), b (E//2,)
    # fu.conv_layer: Conv2d(E, E, 1) -> (E, E),    b (E,)    (E = (E//2)*2)
    # conv2: Conv2d(E//2, E, 1)      -> (E, E//2), b (E,)
    w1 = 0.2 * jax.random.normal(k1, (E // 2, E), jnp.float32)
    b1 = 0.1 * jax.random.normal(k2, (E // 2,), jnp.float32)
    wfu = 0.2 * jax.random.normal(k3, (E, E), jnp.float32)
    bfu = 0.1 * jax.random.normal(k4, (E,), jnp.float32)
    w2 = 0.2 * jax.random.normal(k5, (E, E // 2), jnp.float32)
    b2 = 0.1 * jax.random.normal(k6, (E,), jnp.float32)
    params = (w1, b1, wfu, bfu, w2, b2)

    x = jax.random.normal(kx, (B, E, H, W), jnp.float32)

    out = jax.block_until_ready(spectral_transform(x, params))
    ref = jax.block_until_ready(spectral_transform_ref(x, params))

    assert out.shape == (B, E, H, W), out.shape
    assert jnp.allclose(out, ref, atol=1e-4, rtol=1e-4), (
        float(jnp.max(jnp.abs(out - ref))))

    print("KERNEL_OK")
</pallas_src>

<mosaic_0001>
module attributes {stable_mosaic.version = 11 : i64} {
  func.func @_conv1x1_lrelu_kernel(%arg0: i32, %arg1: i32, %arg2: memref<1x4x256xf32, #tpu.memory_space<vmem>>, %arg3: memref<2x4xf32, #tpu.memory_space<vmem>>, %arg4: memref<2x1xf32, #tpu.memory_space<vmem>>, %arg5: memref<1x2x256xf32, #tpu.memory_space<vmem>>) attributes {dimension_semantics = [#tpu.dimension_semantics<parallel>, #tpu.dimension_semantics<parallel>], iteration_bounds = array<i64: 2, 1>, scalar_prefetch = 0 : i64, scratch_operands = 0 : i64, tpu.core_type = #tpu.core_type<tc>, window_params = [{transform_indices = @transform_0, window_bounds = array<i64: 1, 4, 256>}, {pipeline_mode = #tpu.pipeline_mode<synchronous>, transform_indices = @transform_1, window_bounds = array<i64: 2, 4>}, {pipeline_mode = #tpu.pipeline_mode<synchronous>, transform_indices = @transform_2, window_bounds = array<i64: 2, 1>}, {transform_indices = @transform_3, window_bounds = array<i64: 1, 2, 256>}]} {
    %c0 = arith.constant 0 : index
    %c0_0 = arith.constant 0 : index
    %0 = vector.load %arg3[%c0, %c0_0] : memref<2x4xf32, #tpu.memory_space<vmem>>, vector<2x4xf32>
    %c0_1 = arith.constant 0 : index
    %c0_2 = arith.constant 0 : index
    %c0_3 = arith.constant 0 : index
    %1 = vector.load %arg2[%c0_1, %c0_2, %c0_3] : memref<1x4x256xf32, #tpu.memory_space<vmem>>, vector<1x4x256xf32>
    %2 = vector.shape_cast %1 : vector<1x4x256xf32> to vector<4x256xf32>
    %cst = arith.constant dense<0.000000e+00> : vector<2x256xf32>
    %3 = tpu.matmul %0, %2, %cst {dimension_numbers = #tpu.dot_dimension_numbers<[1], [0], [0], [1], [0, 0, 1, 1], [], []>} : vector<2x4xf32>, vector<4x256xf32>, vector<2x256xf32> -> vector<2x256xf32>
    %c0_4 = arith.constant 0 : index
    %c0_5 = arith.constant 0 : index
    %4 = vector.load %arg4[%c0_4, %c0_5] : memref<2x1xf32, #tpu.memory_space<vmem>>, vector<2x1xf32>
    %5 = vector.broadcast %4 : vector<2x1xf32> to vector<2x256xf32>
    %6 = arith.addf %3, %5 : vector<2x256xf32>
    %cst_6 = arith.constant 0.000000e+00 : f32
    %7 = vector.broadcast %cst_6 : f32 to vector<2x256xf32>
    %8 = arith.cmpf oge, %6, %7 : vector<2x256xf32>
    %cst_7 = arith.constant 2.000000e-01 : f32
    %9 = vector.broadcast %cst_7 : f32 to vector<2x256xf32>
    %10 = arith.mulf %9, %6 : vector<2x256xf32>
    %11 = arith.select %8, %6, %10 : vector<2x256xi1>, vector<2x256xf32>
    %c0_8 = arith.constant 0 : index
    %c0_9 = arith.constant 0 : index
    %c0_10 = arith.constant 0 : index
    %12 = vector.load %arg5[%c0_8, %c0_9, %c0_10] : memref<1x2x256xf32, #tpu.memory_space<vmem>>, vector<1x2x256xf32>
    %13 = vector.shape_cast %12 : vector<1x2x256xf32> to vector<2x256xf32>
    %14 = vector.shape_cast %11 : vector<2x256xf32> to vector<1x2x256xf32>
    tpu.vector_store %arg5[%c0_8, %c0_9, %c0_10], %14 {strides = array<i32>} : memref<1x2x256xf32, #tpu.memory_space<vmem>>, vector<1x2x256xf32>,
    return
  }
  func.func @transform_0(%arg0: i32, %arg1: i32) -> (i32, i32, i32) {
    %c0_i32 = arith.constant 0 : i32
    %c0_i32_0 = arith.constant 0 : i32
    return %arg0, %c0_i32, %arg1 : i32, i32, i32
  }
  func.func @transform_1(%arg0: i32, %arg1: i32) -> (i32, i32) {
    %c0_i32 = arith.constant 0 : i32
    %c0_i32_0 = arith.constant 0 : i32
    %c0_i32_1 = arith.constant 0 : i32
    return %c0_i32, %c0_i32_0 : i32, i32
  }
  func.func @transform_2(%arg0: i32, %arg1: i32) -> (i32, i32) {
    %c0_i32 = arith.constant 0 : i32
    %c0_i32_0 = arith.constant 0 : i32
    %c0_i32_1 = arith.constant 0 : i32
    return %c0_i32, %c0_i32_0 : i32, i32
  }
  func.func @transform_3(%arg0: i32, %arg1: i32) -> (i32, i32, i32) {
    %c0_i32 = arith.constant 0 : i32
    %c0_i32_0 = arith.constant 0 : i32
    return %arg0, %c0_i32, %arg1 : i32, i32, i32
  }
}

</mosaic_0001>

<bundles_post_ra>
// kernel: tpu_custom_call.1
= control target key start
LH: loop header
LB: loop body
LE: loop exit
PB: predicated region body
PF: predicated region fallthrough
CT: control target
= control target key end

     0   :  { %8 = vsyncpa [#allocation3], 0  ;;  %s820_s0 = inlined_call_operand.hbm [shape: f32[2,4,256], index: 0, kind: input, shape index: {}]   ;;  %s821_s1 = inlined_call_operand.vmem [shape: f32[2,4], index: 1, kind: input, shape index: {}]   ;;  %s822_s2 = inlined_call_operand.vmem [shape: f32[2,1], index: 2, kind: input, shape index: {}]   ;;  %s823_s3 = inlined_call_operand.hbm [shape: f32[2,2,256], index: 3, kind: output, shape index: {}]  }
   0x1   :  { %10 = vsyncpa [#allocation3 + $0x1], 0 }
   0x2   :  { %11 = vsyncpa [#allocation4], 0 }
   0x3   :  { %13 = vsyncpa [#allocation4 + $0x1], 0  ;;  %s641_s12 = smov 0   ;;  %s643_s13 = smov 0  }
   0x4   :  { %s645_s14 = smov 0   ;;  %s647_s15 = smov 0  }
   0x5   :  { %s649_s16 = smov 0   ;;  %s651_s17 = smov 0  }
   0x6 LB: > { %s416_s18 = sadd.s32 4294967295, %s615_s17   ;;  %s417_s19 = sadd.s32 4294967294, %s615_s17   ;;  %s615_s17 = sphi %s651_s17, %s19_s17   ;;  %s611_s16 = sphi %s649_s16, %s839_s16   ;;  %s607_s15 = sphi %s647_s15, %s838_s15   ;;  %s603_s14 = sphi %s645_s14, %s837_s14   ;;  %s599_s13 = sphi %s643_s13, %s836_s13   ;;  %s595_s12 = sphi %s641_s12, %s835_s12  }
   0x7   : > { %s31_s20 = sadd.s32 1, %s611_s16  ;;  %s40_s21 = sadd.s32 1, %s603_s14 }
   0x8   : > { %p33_p0 = scmp.ge.s32.totalorder %s31_s20, 2  ;;  %p47_p1 = scmp.ne.s32.totalorder %s603_s14, %s599_s13 }
   0x9   : > { %p48_p2 = scmp.eq.s32.totalorder %s615_s17, 0  ;;  %p53_p3 = scmp.ne.s32.totalorder %s599_s13, %s595_s12 }
   0xa   : > { %s841_s20 = smov (%p33_p0, %s31_s20), 0  ;;  %p54_p5 = scmp.eq.s32.totalorder %s416_s18, 0 }
   0xb   : > { %p682_p4 = por %p48_p2, %p47_p1  ;;  %s35_s23 = ssub.s32 %s611_s16, %s841_s20 }
   0xc   : > { %p121_p6 = scmp.eq.s32.totalorder %s416_s18, 1  ;;  %p38_p7 = scmp.eq.s32.totalorder %s35_s23, 0 }
   0xd   : > { %p688_p8 = por %p54_p5, %p53_p3  ;;  %p127_p10 = scmp.eq.s32.totalorder %s417_s19, 1 }
   0xe   : > { %p692_p9 = por %p121_p6, %p47_p1  ;;  %p449_p13 = scmp.lt.s32.totalorder %s615_s17, 2 }
   0xf   : > { %s697_s26 = scalar_select %p38_p7, %s603_s14, %s40_s21  }
  0x10   : > { %s827_s25 = scalar_select %p692_p9, 1, 0 }
  0x11   : > { %p699_p11 = por %p127_p10, %p53_p3  ;;  %s153_s28 = sand.u32 1, %s603_s14  }
  0x12   : > { %s420_s29 = sshll.u32 %s153_s28, 3  ;;  %s435_s30 = sshll.u32 %s611_s16, 7 }
  0x13   : > { %s828_s27 = scalar_select %p699_p11, 1, 0 }
  0x14   : > { %s710_s6 = scalar_lea.hbm %s820_s0, %s435_s30  ;;  %s157_s7 = scalar_lea.vmem [#allocation2], %s420_s29 }
  0x15   : > { %s167_s8 = sshll.u32 %s157_s7, 4  ;;  %p716_p0 = pnand %p449_p13, %p682_p4  ;;  %s712_s8 = int_to_ptr.vmem [resolvable:$true] %s167_s8 }
  0x16   : > { %s154_s10 = scalar_lea.sflag [#allocation3], %s153_s28  ;;  %s503_s11 = scalar_lea.hbm %s710_s6, 128 }
  0x17   : > { %p504_p3 = scmp.ne.s32.totalorder %s710_s6, %s503_s11  ;;  %p505_p5 = pneg %p716_p0 }
  0x18   : > { %s508_s21 = scalar_lea.hbm %s820_s0, 256  ;;  %p509_p4 = scmp.lt.u32.totalorder %s710_s6, %s820_s0 }
  0x19   : > { %p506_p6 = pnand %p505_p5, %p504_p3  ;;  %p510_p10 = scmp.lt.u32.totalorder %s508_s21, %s503_s11 }
  0x1a   : > { %p512_p12 = scmp.lt.u32.totalorder %s503_s11, %s710_s6 }
  0x1b   : > { %p507_p7 = pneg %p506_p6  ;;  %p511_p13 = por %p510_p10, %p509_p4 }
  0x1d   : > { %p513_p1 = por %p512_p12, %p511_p13 }
  0x1f   : > { %p514_p2 = pnand %p513_p1, %p507_p7 }
  0x21   : > { %517 = shalt.err (!%p514_p2)
}
  0x22   : > { %s518_s28 = scalar_lea.vmem %s712_s8, 128  ;;  %s617_s29 = smov [#allocation2]  }
  0x23   : > { %p519_p3 = scmp.ne.s32.totalorder %s712_s8, %s518_s28  ;;  %s523_s30 = sshll.u32 %s617_s29, 4  ;;  %s524_s30 = int_to_ptr.vmem [resolvable:$false] %s523_s30 }
  0x24   : > { %s525_s4 = scalar_lea.vmem %s524_s30, 256  ;;  %p526_p9 = scmp.lt.s32.totalorder %s712_s8, %s524_s30 }
  0x25   : > { %p521_p6 = pnand %p519_p3, %p505_p5  ;;  %p527_p4 = scmp.lt.s32.totalorder %s525_s4, %s518_s28 }
  0x27   : > { %p522_p11 = pneg %p521_p6  ;;  %p528_p10 = por %p527_p4, %p526_p9 }
  0x29   : > { %p529_p12 = pnand %p528_p10, %p522_p11 }
  0x2b   : > { %532 = shalt.err (!%p529_p12)
}
  0x2c   : > { %444 = dma.hbm_to_vmem [thread:$0]  (!%p716_p0), %s710_s6, 128, %s712_s8, %s154_s10  }
  0x2d   : > { %p830_p1 = scmp.lt.s32.totalorder %s615_s17, 3  ;;  %p831_p2 = scmp.ge.s32.totalorder %s615_s17, 1 }
  0x2f   : > { %p173_p5 = pnand %p831_p2, %p830_p1 }
  0x30   : > { %s752_s5 = sand.u32 (!%p173_p5), 1, %s599_s13  }
  0x31   : > { %176 = sbr.rel (%p173_p5) target bundleno = 296 (0x128), region = 32  ;;  %s424_s7 = sshll.u32 (!%p173_p5), %s752_s5, 3 }
  0x32   : > { %s179_s11 = scalar_lea.sflag (!%p173_p5), [#allocation3], %s752_s5  ;;  %s182_s18 = scalar_lea.vmem (!%p173_p5), [#allocation2], %s424_s7 }
  0x38   : > { %586 = dma.done.wait (%p688_p8), %s179_s11, 128  }
  0x39   : > { %588 = vsyncadd (%p688_p8), %s179_s11, 4294967168  ;;  %v618_v0 = vmov 0.0   ;;  %v619_v1 = vmov 0   ;;  %v208_v2 = vld [vmem:[%s182_s18] sm:$0xff]  ;;  %vm221_vm0 = vcmask 1043456   ;;  %vm217_vm1 = vcmask 31744  }
  0x3a   : > { %290 = vmatprep.mubr.f32.mxu0 %v618_v0  ;;  %501 = vset.pattern.permute.xlu0 %v619_v1  ;;  %v209_v3 = vld [vmem:[%s822_s2] sm:$0x3]  ;;  %v216_v4 = vcombine.high %v208_v2, %v208_v2  ;;  %s425_s24 = sshll.u32 %s752_s5, 2  ;;  %s436_s19 = sshll.u32 %s607_s15, 6 }
  0x3b   : > { %212 = vperm.xlu0 %501, %v209_v3   ;;  %v207_v5 = vld [vmem:[%s821_s1] sm:$0x3]  ;;  %s204_s21 = scalar_lea.vmem [#allocation5], %s425_s24  ;;  %s771_s29 = scalar_lea.hbm %s823_s3, %s436_s19 }
  0x3c   : > { %426 = vmatprep.subr.msk.mxu0 %vm221_vm0, %v216_v4  ;;  %s332_s22 = sshll.u32 %s204_s21, 4  ;;  %s316_s30 = scalar_lea.sflag [#allocation4], %s752_s5  ;;  %s773_s22 = int_to_ptr.vmem [resolvable:$true] %s332_s22 }
  0x3d   : > { %427 = vmatpush1.msk.msra.mxu0 %vm221_vm0, %v208_v2  ;;  %s533_s4 = scalar_lea.vmem %s773_s22, 64  ;;  %p832_p9 = scmp.ne.s32.totalorder %s827_s25, 0 }
  0x3e   : > { %428 = vmatmul.mubr.msk.f32.vlgmr.msra.gmra.mrb[0].mxu0 %vm217_vm1, %v207_v5  ;;  %p534_p8 = scmp.ne.s32.totalorder %s773_s22, %s533_s4  ;;  %s620_s15 = smov [#allocation5]  }
  0x3f   : > { %s537_s7 = sshll.u32 %s620_s15, 4  ;;  %s538_s7 = int_to_ptr.vmem [resolvable:$false] %s537_s7 }
  0x40   : > { %p535_p11 = pnand %p534_p8, %p832_p9  ;;  %s539_s11 = scalar_lea.vmem %s538_s7, 128 }
  0x41   : > { %p540_p7 = scmp.lt.s32.totalorder %s773_s22, %s538_s7  ;;  %p541_p13 = scmp.lt.s32.totalorder %s539_s11, %s533_s4 }
  0x42   : > { %p536_p0 = pneg %p535_p11 }
  0x43   : > { %p542_p3 = por %p541_p13, %p540_p7 }
  0x45   : > { %p543_p6 = pnand %p542_p3, %p536_p0 }
  0xba   : > { %v213_v6 = vpop.permute.xlu0 %212 }
 0x111   : > { %v292_v7 = vpop.f32.mrb[0].mxu0 }
 0x112   : > { %v293_v8 = vadd.f32 %v292_v7, %v213_v6  ;;  %v294_v9 = vpop.f32.mrb[1].mxu0 }
 0x113   : > { %v295_v10 = vadd.f32 %v294_v9, %v213_v6 }
 0x114   : > { %vm297_vm2 = vcmp.ge.f32.partialorder %v293_v8, 0.0  ;;  %v299_v11 = vmul.f32 0.2, %v293_v8 }
 0x115   : > { %vm298_vm3 = vcmp.ge.f32.partialorder %v295_v10, 0.0  ;;  %v300_v12 = vmul.f32 0.2, %v295_v10 }
 0x116   : > { %v301_v13 = vsel %vm297_vm2, %v293_v8, %v299_v11 }
 0x117   : > { %v302_v14 = vsel %vm298_vm3, %v295_v10, %v300_v12 }
 0x118   : > { %v305_v15 = vcombine.low %v301_v13, %v302_v14 }
 0x11a   : > { %429 = vst.sshfl [vmem:[%s204_s21] sm:$0x33 pattern:$0x76325410] %v305_v15 }
 0x11b   : > { %546 = shalt.err (!%p543_p6)
}
 0x11c   : > { %s547_s5 = scalar_lea.hbm %s771_s29, 64  ;;  %s551_s8 = scalar_lea.hbm %s823_s3, 128 }
 0x11d   : > { %p548_p4 = scmp.ne.s32.totalorder %s771_s29, %s547_s5  ;;  %p552_p1 = scmp.lt.u32.totalorder %s771_s29, %s823_s3 }
 0x11e   : > { %p553_p2 = scmp.lt.u32.totalorder %s551_s8, %s547_s5  ;;  %p555_p8 = scmp.lt.u32.totalorder %s547_s5, %s771_s29 }
 0x11f   : > { %p549_p10 = pnand %p548_p4, %p832_p9 }
 0x120   : > { %p554_p5 = por %p553_p2, %p552_p1 }
 0x121   : > { %p550_p12 = pneg %p549_p10 }
 0x122   : > { %p556_p11 = por %p555_p8, %p554_p5 }
 0x124   : > { %p557_p0 = pnand %p556_p11, %p550_p12 }
 0x126   : > { %560 = shalt.err (!%p557_p0)
}
 0x127   : > { %439 = dma.vmem_to_hbm [thread:$0]  (%p832_p9), %s773_s22, 64, %s771_s29, %s316_s30  }
 0x128 PF: > { %s344_s24 = sand.u32 1, %s595_s12   ;;  %p833_p7 = scmp.ne.s32.totalorder %s828_s27, 0 }
 0x129   : > { %p834_p13 = scmp.ge.s32.totalorder %s615_s17, 2  ;;  %s345_s19 = scalar_lea.sflag [#allocation4], %s344_s24 }
 0x12b   : > { %p446_p3 = pnand %p834_p13, %p833_p7 }
 0x12d   : > { %590 = dma.done.wait (!%p446_p3), %s345_s19, 64  }
 0x12e   : > { %592 = vsyncadd (!%p446_p3), %s345_s19, 4294967232  ;;  %s19_s17 = sadd.s32 1, %s615_s17   ;;  %s835_s12 = smov %s599_s13 }
 0x12f   : > { %p16_p6 = scmp.ge.s32.totalorder %s19_s17, 4   ;;  %s836_s13 = smov %s603_s14 }
 0x130   : > { %s837_s14 = smov %s697_s26  ;;  %s838_s15 = smov %s611_s16 }
 0x131   : > { %s839_s16 = smov %s841_s20  ;;  %18 = sbr.rel (!%p16_p6) target bundleno = 6 (0x6), region = 77 }
 0x138   :  { %350 = vsyncpa [#allocation3], 1 }
 0x139   :  { %352 = vsyncpa [#allocation3 + $0x1], 1 }
 0x13a   :  { %353 = vsyncpa [#allocation4], 1 }
 0x13b   :  { %355 = vsyncpa [#allocation4 + $0x1], 1 }

</bundles_post_ra>
